<compile_context>
chip_gen: v5e
topology: v5e:2x2
jax: 0.10.0
libtpu: 0.0.40
codegen_flags: <defaults>
</compile_context>

<pallas_src>
import jax
import jax.numpy as jnp
from jax.experimental import pallas as pl
from jax.experimental.pallas import tpu as pltpu


# ----------------------------------------------------------------------------
# Production path: plain identity (what Scalar.forward() really is).
# ----------------------------------------------------------------------------
def scalar_forward(constant_param: jax.Array) -> jax.Array:
    """Exact equivalent of Scalar.forward(): return the parameter.

    No pallas_call: a 4-byte identity has zero compute, so any kernel launch
    would be 100% overhead. Plain JAX keeps it free, fusible, and
    differentiable (needed since `constant` is a learnable parameter).
    """
    return constant_param


# ----------------------------------------------------------------------------
# Pallas harness path (kept so a kernel exists to compile/benchmark).
# ----------------------------------------------------------------------------
def _scalar_kernel(const_ref, out_ref):
    # The entire "forward pass": copy the scalar through on the SMEM path.
    out_ref[0] = const_ref[0]


@jax.jit
def scalar_forward_pallas(constant_param: jax.Array) -> jax.Array:
    """Pallas shell around Scalar.forward() for harness use.

    constant_param: 0-d float32 array holding the learnable scalar.
    Returns: 0-d float32 array.
    """
    x = constant_param.reshape((1,)).astype(jnp.float32)
    out = pl.pallas_call(
        _scalar_kernel,
        out_shape=jax.ShapeDtypeStruct((1,), jnp.float32),
        in_specs=[pl.BlockSpec(memory_space=pltpu.SMEM)],
        out_specs=pl.BlockSpec(memory_space=pltpu.SMEM),
        # Alias output onto the input buffer: no output allocation / copy-back.
        input_output_aliases={0: 0},
    )(x)
    # Reshape back to 0-d inside the same jit -> metadata-only, no extra op.
    return out.reshape(())


def init_scalar_params(init_value: float) -> jax.Array:
    # Deterministic init, exactly as nn.Parameter(torch.tensor(init_value)).
    # Stored as a 0-d array to match torch's () shape with no reshapes needed.
    return jnp.asarray(init_value, dtype=jnp.float32)


if __name__ == "__main__":
    # PRNGKey(0) kept for convention; init is deterministic from init_value.
    _ = jax.random.PRNGKey(0)

    init_value = 0.5
    constant = init_scalar_params(init_value)

    # 1) Recommended production path: plain identity.
    result = scalar_forward(constant)
    jax.block_until_ready(result)
    assert result.shape == ()
    assert result.dtype == jnp.float32
    assert float(result) == init_value

    # Differentiability check (learnable TQC alpha/temperature needs grads).
    grad = jax.grad(lambda c: scalar_forward(c))(constant)
    jax.block_until_ready(grad)
    assert float(grad) == 1.0

    # 2) Pallas harness path: run the kernel once and verify.
    result_pallas = scalar_forward_pallas(constant)
    jax.block_until_ready(result_pallas)
    assert result_pallas.shape == ()
    assert result_pallas.dtype == jnp.float32
    assert float(result_pallas) == init_value

    print("KERNEL_OK")
</pallas_src>

<mosaic_0001>
module attributes {stable_mosaic.version = 11 : i64} {
  func.func @_scalar_kernel(%arg0: memref<1xf32, #tpu.memory_space<smem>>, %arg1: memref<1xf32, #tpu.memory_space<smem>>) attributes {dimension_semantics = [], scalar_prefetch = 0 : i64, scratch_operands = 0 : i64, tpu.core_type = #tpu.core_type<tc>} {
    %c0 = arith.constant 0 : index
    %0 = memref.load %arg0[%c0] : memref<1xf32, #tpu.memory_space<smem>>
    %c0_0 = arith.constant 0 : index
    %1 = memref.load %arg1[%c0_0] : memref<1xf32, #tpu.memory_space<smem>>
    memref.store %0, %arg1[%c0_0] : memref<1xf32, #tpu.memory_space<smem>>
    return
  }
}

</mosaic_0001>

<bundles_post_ra>
// kernel: scalar_forward_pallas.1
= control target key start
LH: loop header
LB: loop body
LE: loop exit
PB: predicated region body
PF: predicated region fallthrough
CT: control target
= control target key end

     0   :  { %7 = vsyncpa [#allocation4], 0  ;;  %s43_s11 = smov [#allocation3]   ;;  %s60_s0 = inlined_call_operand.<no memory space> [shape: f32[1], index: 0, kind: input, shape index: {}, may-alias: {0,1}]   ;;  %s61_s1 = inlined_call_operand.hbm [shape: f32[1], index: 1, kind: output, shape index: {}, may-alias: {0,1}]  }
   0x1   :  { %12 = sst [smem:[#allocation3]] %s60_s0  ;;  %s18_s10 = sshll.u32 %s61_s1, 4  ;;  %s19_s10 = int_to_ptr.hbm [resolvable:$true] %s18_s10 }
   0x2   :  { %21 = dma.smem_to_hbm %s43_s11, 16, %s19_s10, [#allocation4]  }
   0x3   :  { %41 = dma.done.wait [#allocation4], 16  }
   0x4   :  { %42 = vsyncadd [#allocation4], 4294967280 }
   0x5   :  { %26 = sfence }
   0x6   :  { %27 = vsyncpa [#allocation4], 1 }

</bundles_post_ra>
